<compile_context>
chip_gen: v5e
topology: v5e:2x2
jax: 0.10.0
libtpu: 0.0.40
codegen_flags: <defaults>
</compile_context>

<pallas_src>
import functools

import jax
import jax.numpy as jnp
from jax import lax
from jax.experimental import pallas as pl
from jax.experimental.pallas import tpu as pltpu


_VMEM_LIMIT = 48 * 1024 * 1024     # scoped-VMEM limit: fits every chip's physical VMEM
_BLOCK_BUDGET = 6 * 1024 * 1024    # target input bytes per grid block
_FUSED_LIMIT = 6 * 1024 * 1024     # use fused path if f32 copy of x fits this


# ----------------------------------------------------------------------------
# Kernels
# ----------------------------------------------------------------------------
def _stats_kernel(x_ref, psum_ref, psq_ref, sum_acc, sq_acc, *, hw, tile, need_mask):
    """Pass 1: per-N-chunk partial per-channel sum / sumsq over the HW tiles."""
    t = pl.program_id(1)

    @pl.when(t == 0)
    def _init():
        sum_acc[...] = jnp.zeros_like(sum_acc)
        sq_acc[...] = jnp.zeros_like(sq_acc)

    x = x_ref[...].astype(jnp.float32)                      # (nb, C, tile)
    if need_mask:
        # Partial edge tile along HW: zero out-of-range lanes (OOB reads are
        # unspecified) so they contribute 0 to sum and sumsq.
        lane = lax.broadcasted_iota(jnp.int32, x.shape, x.ndim - 1)
        x = jnp.where(lane + t * tile < hw, x, 0.0)

    # Lane reduction per tile into tiny (C,1) accumulators (hidden under DMA).
    sum_acc[...] += jnp.sum(jnp.sum(x, axis=2, keepdims=True), axis=0)
    sq_acc[...] += jnp.sum(jnp.sum(x * x, axis=2, keepdims=True), axis=0)

    @pl.when(t == pl.num_programs(1) - 1)
    def _finalize():
        psum_ref[...] = sum_acc[...]
        psq_ref[...] = sq_acc[...]


def _norm_kernel(x_ref, scale_ref, shift_ref, y_ref):
    """Pass 2: y = x * scale + shift (scale/shift precomputed per channel)."""
    x = x_ref[...].astype(jnp.float32)                      # (nb, C, tile)
    y_ref[...] = (x * scale_ref[...] + shift_ref[...]).astype(y_ref.dtype)


def _fused_kernel(x_ref, y_ref, mean_ref, var_ref, *, eps, inv_l):
    """Fused path: whole activation resident in VMEM; one read, one write."""
    x = x_ref[...].astype(jnp.float32)                      # (N, C, HW)
    s = jnp.sum(jnp.sum(x, axis=2, keepdims=True), axis=0)          # (C, 1)
    ss = jnp.sum(jnp.sum(x * x, axis=2, keepdims=True), axis=0)     # (C, 1)
    mean = s * inv_l
    var = jnp.maximum(ss * inv_l - mean * mean, 0.0)
    scale = lax.rsqrt(var + eps)
    shift = -mean * scale
    y_ref[...] = (x * scale + shift).astype(y_ref.dtype)
    mean_ref[...] = mean
    var_ref[...] = var


# ----------------------------------------------------------------------------
# Block-size selection
# ----------------------------------------------------------------------------
def _round_down_128(v):
    return max(128, (v // 128) * 128)


def _pick_blocks(N, C, HW, itemsize, budget_bytes):
    """Pick (nb, tile): nb divides N; tile is a 128-multiple (or == HW < 128)."""
    col_bytes = max(C * itemsize, 1)
    max_tile = _round_down_128(budget_bytes // col_bytes)
    if HW < 128:
        tile = HW                              # full-extent lane dim (allowed)
    elif HW % 128 == 0:
        tile = min(HW, max_tile)
    else:
        tile = min(max_tile, (HW // 128) * 128)  # partial edge tile handled by masking
    block_bytes = C * tile * itemsize
    nb = 1
    for d in range(1, N + 1):                  # batch-block over N for small maps
        if N % d == 0 and d * block_bytes <= budget_bytes:
            nb = d
    return nb, tile


# ----------------------------------------------------------------------------
# pallas_call wrappers
# ----------------------------------------------------------------------------
def _batch_stats(x3, nb, tile, vmem_limit):
    """x3: (N, C, HW). Returns per-N-chunk partial (sum, sumsq), each (NC, C, 1)."""
    N, C, HW = x3.shape
    NC = N // nb
    n_tiles = pl.cdiv(HW, tile)
    need_mask = (HW % tile) != 0
    itemsize = x3.dtype.itemsize

    kernel = functools.partial(_stats_kernel, hw=HW, tile=tile, need_mask=need_mask)
    psum, psq = pl.pallas_call(
        kernel,
        out_shape=(
            jax.ShapeDtypeStruct((NC, C, 1), jnp.float32),
            jax.ShapeDtypeStruct((NC, C, 1), jnp.float32),
        ),
        grid_spec=pltpu.PrefetchScalarGridSpec(
            num_scalar_prefetch=0,
            grid=(NC, n_tiles),
            in_specs=[pl.BlockSpec((nb, C, tile), lambda i, t: (i, 0, t))],
            out_specs=(
                pl.BlockSpec((None, C, 1), lambda i, t: (i, 0, 0)),
                pl.BlockSpec((None, C, 1), lambda i, t: (i, 0, 0)),
            ),
            scratch_shapes=[
                pltpu.VMEM((C, 1), jnp.float32),
                pltpu.VMEM((C, 1), jnp.float32),
            ],
        ),
        compiler_params=pltpu.CompilerParams(
            dimension_semantics=("parallel", "arbitrary"),
            vmem_limit_bytes=vmem_limit),
        cost_estimate=pl.CostEstimate(
            flops=3 * N * C * HW,
            transcendentals=0,
            bytes_accessed=N * C * HW * itemsize + 2 * NC * C * 4),
    )(x3)
    return psum, psq


def _normalize(x3, scale, shift, nb, tile, vmem_limit):
    """x3: (N, C, HW); scale/shift: (C, 1) f32. Returns y (N, C, HW)."""
    N, C, HW = x3.shape
    n_tiles = pl.cdiv(HW, tile)
    itemsize = x3.dtype.itemsize
    # TODO(synk): pipeline_mode=pl.Buffered(3) on the x BlockSpec is a possible
    # further win now that scratch no longer scales with the tile.
    return pl.pallas_call(
        _norm_kernel,
        out_shape=jax.ShapeDtypeStruct((N, C, HW), x3.dtype),
        grid_spec=pltpu.PrefetchScalarGridSpec(
            num_scalar_prefetch=0,
            grid=(N // nb, n_tiles),
            in_specs=[
                pl.BlockSpec((nb, C, tile), lambda i, t: (i, 0, t)),
                pl.BlockSpec((C, 1), lambda i, t: (0, 0)),
                pl.BlockSpec((C, 1), lambda i, t: (0, 0)),
            ],
            out_specs=pl.BlockSpec((nb, C, tile), lambda i, t: (i, 0, t)),
        ),
        compiler_params=pltpu.CompilerParams(
            dimension_semantics=("parallel", "parallel"),
            vmem_limit_bytes=vmem_limit),
        cost_estimate=pl.CostEstimate(
            flops=2 * N * C * HW,
            transcendentals=0,
            bytes_accessed=2 * N * C * HW * itemsize + 2 * C * 4),
    )(x3, scale, shift)


def _fused_bn(x3, eps, vmem_limit):
    """Single-call fused stats+normalize for activations resident in VMEM."""
    N, C, HW = x3.shape
    L = N * HW
    itemsize = x3.dtype.itemsize
    kernel = functools.partial(_fused_kernel, eps=float(eps), inv_l=1.0 / float(L))
    return pl.pallas_call(
        kernel,
        out_shape=(
            jax.ShapeDtypeStruct((N, C, HW), x3.dtype),
            jax.ShapeDtypeStruct((C, 1), jnp.float32),
            jax.ShapeDtypeStruct((C, 1), jnp.float32),
        ),
        compiler_params=pltpu.CompilerParams(vmem_limit_bytes=vmem_limit),
        cost_estimate=pl.CostEstimate(
            flops=5 * N * C * HW,
            transcendentals=C,
            bytes_accessed=2 * N * C * HW * itemsize + 2 * C * 4),
    )(x3)


# ----------------------------------------------------------------------------
# Public forward (matches AdaptiveBatchNorm2d.forward semantics)
# ----------------------------------------------------------------------------
def adaptive_batch_norm2d(x, running_mean=None, running_var=None, *,
                          eps=1e-5, momentum=0.1, training=True,
                          track_running_stats=True, num_batches_tracked=0,
                          block_budget_bytes=_BLOCK_BUDGET,
                          fused_vmem_bytes=_FUSED_LIMIT,
                          vmem_limit_bytes=_VMEM_LIMIT):
    """x: (N, C, H, W). Returns (y, new_running_mean, new_running_var)."""
    if x.ndim != 4:
        raise ValueError(f"expected 4D input (got {x.ndim}D input)")
    N, C, H, W = x.shape
    HW = H * W
    L = N * HW

    x3 = x.reshape(N, C, HW)                       # free reshape (no transpose)

    have_running = (track_running_stats and running_mean is not None
                    and running_var is not None)
    bn_training = training or not have_running     # F.batch_norm's bn_training

    if bn_training:
        if N * C * HW * 4 <= fused_vmem_bytes:
            # Small activation: fused single-call path (2x HBM traffic).
            y3, mean2, var2 = _fused_bn(x3, eps, vmem_limit_bytes)
            mean_c, var_c = mean2[:, 0], var2[:, 0]
        else:
            nb, tile = _pick_blocks(N, C, HW, x.dtype.itemsize, block_budget_bytes)
            psum, psq = _batch_stats(x3, nb, tile, vmem_limit_bytes)
            # Tiny cross-chunk combine + mean/var/rsqrt in plain JAX.
            s = jnp.sum(psum[:, :, 0], axis=0)
            ss = jnp.sum(psq[:, :, 0], axis=0)
            mean_c = s / float(L)
            # TODO(synk): E[x^2]-mean^2 in f32 cancels when |mean| >> std; a
            # centered second stats pass would be needed for such inputs.
            var_c = jnp.maximum(ss / float(L) - mean_c * mean_c, 0.0)
            rstd = lax.rsqrt(var_c + float(eps))
            scale = rstd.reshape(C, 1)
            shift = (-mean_c * rstd).reshape(C, 1)
            y3 = _normalize(x3, scale, shift, nb, tile, vmem_limit_bytes)
    else:
        # Eval mode: normalize with running stats.
        mean_c = running_mean.astype(jnp.float32)
        var_c = running_var.astype(jnp.float32)
        rstd = lax.rsqrt(var_c + float(eps))
        scale = rstd.reshape(C, 1)
        shift = (-mean_c * rstd).reshape(C, 1)
        nb, tile = _pick_blocks(N, C, HW, x.dtype.itemsize, block_budget_bytes)
        y3 = _normalize(x3, scale, shift, nb, tile, vmem_limit_bytes)

    y = y3.reshape(N, C, H, W)

    if training and have_running:
        eaf = (float(momentum) if momentum is not None
               else 1.0 / float(num_batches_tracked + 1))
        unbiased = var_c * (float(L) / float(max(L - 1, 1)))  # PyTorch uses unbiased
        new_rm = (1.0 - eaf) * running_mean + eaf * mean_c.astype(running_mean.dtype)
        new_rv = (1.0 - eaf) * running_var + eaf * unbiased.astype(running_var.dtype)
    else:
        new_rm, new_rv = running_mean, running_var

    return y, new_rm, new_rv


# ----------------------------------------------------------------------------
# Self-test
# ----------------------------------------------------------------------------
if __name__ == "__main__":
    key = jax.random.PRNGKey(0)
    N, C, H, W = 2, 4, 16, 16
    x = jax.random.normal(key, (N, C, H, W), dtype=jnp.float32)

    running_mean = jnp.zeros((C,), dtype=jnp.float32)
    running_var = jnp.ones((C,), dtype=jnp.float32)

    def ref_train(xx, eps=1e-5):
        m = jnp.mean(xx, axis=(0, 2, 3), keepdims=True)
        v = jnp.mean((xx - m) ** 2, axis=(0, 2, 3), keepdims=True)
        return (xx - m) / jnp.sqrt(v + eps), m.reshape(-1), v.reshape(-1)

    # 1) Training mode, fused (VMEM-resident) path + running-stats update.
    y, new_rm, new_rv = adaptive_batch_norm2d(
        x, running_mean, running_var, eps=1e-5, momentum=0.1, training=True)
    jax.block_until_ready((y, new_rm, new_rv))
    y_ref, m_ref, v_ref = ref_train(x)
    assert jnp.allclose(y, y_ref, atol=1e-4, rtol=1e-4), "fused train y mismatch"
    L = N * H * W
    rm_ref = 0.9 * running_mean + 0.1 * m_ref
    rv_ref = 0.9 * running_var + 0.1 * (v_ref * L / (L - 1))
    assert jnp.allclose(new_rm, rm_ref, atol=1e-5, rtol=1e-5), "running_mean mismatch"
    assert jnp.allclose(new_rv, rv_ref, atol=1e-5, rtol=1e-5), "running_var mismatch"

    # 2) Training mode, forced streaming two-pass path (multi-tile grid,
    #    per-N partial stats outputs).
    y2, _, _ = adaptive_batch_norm2d(
        x, running_mean, running_var, eps=1e-5, momentum=0.1, training=True,
        fused_vmem_bytes=0, block_budget_bytes=2048)
    jax.block_until_ready(y2)
    assert jnp.allclose(y2, y_ref, atol=1e-4, rtol=1e-4), "two-pass train y mismatch"

    # 3) Training mode, odd spatial size -> partial lane tiles + stats masking.
    x_odd = jax.random.normal(jax.random.PRNGKey(1), (2, 4, 18, 18), jnp.float32)
    y_odd, _, _ = adaptive_batch_norm2d(
        x_odd, None, None, eps=1e-5, momentum=0.1, training=True,
        track_running_stats=False, fused_vmem_bytes=0)
    jax.block_until_ready(y_odd)
    y_odd_ref, _, _ = ref_train(x_odd)
    assert jnp.allclose(y_odd, y_odd_ref, atol=1e-4, rtol=1e-4), "odd-HW y mismatch"

    # 4) Eval mode: normalize with running stats, no update.
    y_eval, rm_e, rv_e = adaptive_batch_norm2d(
        x, running_mean, running_var, eps=1e-5, momentum=0.1, training=False)
    jax.block_until_ready(y_eval)
    y_eval_ref = ((x - running_mean.reshape(1, C, 1, 1))
                  / jnp.sqrt(running_var.reshape(1, C, 1, 1) + 1e-5))
    assert jnp.allclose(y_eval, y_eval_ref, atol=1e-4, rtol=1e-4), "eval y mismatch"

    print("KERNEL_OK")
</pallas_src>

<mosaic_0001>
module attributes {stable_mosaic.version = 11 : i64} {
  func.func @_fused_kernel(%arg0: memref<2x4x256xf32, #tpu.memory_space<vmem>>, %arg1: memref<2x4x256xf32, #tpu.memory_space<vmem>>, %arg2: memref<4x1xf32, #tpu.memory_space<vmem>>, %arg3: memref<4x1xf32, #tpu.memory_space<vmem>>) attributes {dimension_semantics = [], scalar_prefetch = 0 : i64, scratch_operands = 0 : i64, tpu.core_type = #tpu.core_type<tc>} {
    %c0 = arith.constant 0 : index
    %c0_0 = arith.constant 0 : index
    %c0_1 = arith.constant 0 : index
    %0 = vector.load %arg0[%c0, %c0_0, %c0_1] : memref<2x4x256xf32, #tpu.memory_space<vmem>>, vector<2x4x256xf32>
    %cst = arith.constant dense<0.000000e+00> : vector<2x4xf32>
    %1 = vector.multi_reduction <add>, %0, %cst [2] : vector<2x4x256xf32> to vector<2x4xf32>
    %2 = vector.shape_cast %1 : vector<2x4xf32> to vector<2x4x1xf32>
    %cst_2 = arith.constant dense<0.000000e+00> : vector<4x1xf32>
    %3 = vector.multi_reduction <add>, %2, %cst_2 [0] : vector<2x4x1xf32> to vector<4x1xf32>
    %4 = arith.mulf %0, %0 : vector<2x4x256xf32>
    %cst_3 = arith.constant dense<0.000000e+00> : vector<2x4xf32>
    %5 = vector.multi_reduction <add>, %4, %cst_3 [2] : vector<2x4x256xf32> to vector<2x4xf32>
    %6 = vector.shape_cast %5 : vector<2x4xf32> to vector<2x4x1xf32>
    %cst_4 = arith.constant dense<0.000000e+00> : vector<4x1xf32>
    %7 = vector.multi_reduction <add>, %6, %cst_4 [0] : vector<2x4x1xf32> to vector<4x1xf32>
    %cst_5 = arith.constant 0.001953125 : f32
    %8 = vector.broadcast %cst_5 : f32 to vector<4x1xf32>
    %9 = arith.mulf %3, %8 : vector<4x1xf32>
    %cst_6 = arith.constant 0.001953125 : f32
    %10 = vector.broadcast %cst_6 : f32 to vector<4x1xf32>
    %11 = arith.mulf %7, %10 : vector<4x1xf32>
    %12 = arith.mulf %9, %9 : vector<4x1xf32>
    %13 = arith.subf %11, %12 : vector<4x1xf32>
    %cst_7 = arith.constant 0.000000e+00 : f32
    %14 = vector.broadcast %cst_7 : f32 to vector<4x1xf32>
    %15 = arith.maximumf %13, %14 : vector<4x1xf32>
    %cst_8 = arith.constant 9.99999974E-6 : f32
    %16 = vector.broadcast %cst_8 : f32 to vector<4x1xf32>
    %17 = arith.addf %15, %16 : vector<4x1xf32>
    %18 = math.rsqrt %17 : vector<4x1xf32>
    %cst_9 = arith.constant 0.000000e+00 : f32
    %19 = vector.broadcast %cst_9 : f32 to vector<4x1xf32>
    %20 = arith.subf %19, %9 : vector<4x1xf32>
    %21 = arith.mulf %20, %18 : vector<4x1xf32>
    %22 = vector.shape_cast %18 : vector<4x1xf32> to vector<1x4x1xf32>
    %23 = vector.broadcast %22 : vector<1x4x1xf32> to vector<2x4x256xf32>
    %24 = arith.mulf %0, %23 : vector<2x4x256xf32>
    %25 = vector.shape_cast %21 : vector<4x1xf32> to vector<1x4x1xf32>
    %26 = vector.broadcast %25 : vector<1x4x1xf32> to vector<2x4x256xf32>
    %27 = arith.addf %24, %26 : vector<2x4x256xf32>
    %c0_10 = arith.constant 0 : index
    %c0_11 = arith.constant 0 : index
    %c0_12 = arith.constant 0 : index
    %28 = vector.load %arg1[%c0_10, %c0_11, %c0_12] : memref<2x4x256xf32, #tpu.memory_space<vmem>>, vector<2x4x256xf32>
    tpu.vector_store %arg1[%c0_10, %c0_11, %c0_12], %27 {strides = array<i32>} : memref<2x4x256xf32, #tpu.memory_space<vmem>>, vector<2x4x256xf32>,
    %c0_13 = arith.constant 0 : index
    %c0_14 = arith.constant 0 : index
    %29 = vector.load %arg2[%c0_13, %c0_14] : memref<4x1xf32, #tpu.memory_space<vmem>>, vector<4x1xf32>
    tpu.vector_store %arg2[%c0_13, %c0_14], %9 {strides = array<i32>} : memref<4x1xf32, #tpu.memory_space<vmem>>, vector<4x1xf32>,
    %c0_15 = arith.constant 0 : index
    %c0_16 = arith.constant 0 : index
    %30 = vector.load %arg3[%c0_15, %c0_16] : memref<4x1xf32, #tpu.memory_space<vmem>>, vector<4x1xf32>
    tpu.vector_store %arg3[%c0_15, %c0_16], %15 {strides = array<i32>} : memref<4x1xf32, #tpu.memory_space<vmem>>, vector<4x1xf32>,
    return
  }
}

</mosaic_0001>

<bundles_post_ra>
// kernel: tpu_custom_call.1
= control target key start
LH: loop header
LB: loop body
LE: loop exit
PB: predicated region body
PF: predicated region fallthrough
CT: control target
= control target key end

     0   :  { %9 = vsyncpa [#allocation3], 0  ;;  %s277_s0 = inlined_call_operand.hbm [shape: f32[2,4,256], index: 0, kind: input, shape index: {}]   ;;  %s278_s1 = inlined_call_operand.hbm [shape: f32[2,4,256], index: 1, kind: output, shape index: {0}]   ;;  %s279_s2 = inlined_call_operand.vmem [shape: f32[4,1], index: 2, kind: output, shape index: {1}]   ;;  %s280_s3 = inlined_call_operand.vmem [shape: f32[4,1], index: 3, kind: output, shape index: {2}]  }
   0x1   :  { %10 = vsyncpa [#allocation4], 0  ;;  %s15_s14 = sshll.u32 %s277_s0, 4  ;;  %s210_s15 = smov [#allocation2]   ;;  %s16_s14 = int_to_ptr.hbm [resolvable:$true] %s15_s14 }
   0x2   :  { %s17_s16 = sshll.u32 %s210_s15, 4  ;;  %s211_s17 = smov 128   ;;  %s18_s16 = int_to_ptr.vmem [resolvable:$true] %s17_s16 }
   0x3   :  { %s212_s18 = smov 8  }
   0x4   :  { %23 = dma.hbm_to_vmem [thread:$0]  %s16_s14, 256, %s18_s16, [#allocation3], %s211_s17, %s211_s17, %s212_s18  }
   0x5   :  { %206 = dma.done.wait [#allocation3], 256  }
   0x6   :  { %207 = vsyncadd [#allocation3], 4294967040  ;;  %v241_v0 = vld [vmem:[#allocation2] sm:$0xff]  ;;  %v243_v1 = vld [vmem:[#allocation2 + $0x8] sm:$0xff]  ;;  %vm43_vm0 = vcmask 1043456   ;;  %vm121_vm1 = vcmask 3072  }
   0x7   :  { %32 = vst [vmem:[#allocation1] ss:$2 sm:$0xff] %v241_v0  ;;  %v57_v2 = vmul.f32 %v241_v0, %v241_v0  ;;  %v58_v3 = vmul.f32 %v243_v1, %v243_v1  ;;  %v213_v43 = vmov 839922192   ;;  %s130_s24 = sshll.u32 %s278_s1, 4  ;;  %s131_s24 = int_to_ptr.hbm [resolvable:$true] %s130_s24 }
   0x8   :  { %36 = vst [vmem:[#allocation1 + $0x10] ss:$2 sm:$0xff] %v243_v1  ;;  %v105_v44 = vunpack.c.l.s4 %v213_v43 }
   0xa   :  { %v106_v47 = vunpack.c.0.s8 %v105_v44 }
   0xe   :  { %v33_v4 = vld.sshfl [vmem:[#allocation1] sm:$0xff pattern:$0x75316420]  ;;  %v34_v5 = vld.sshfl [vmem:[#allocation1 + $0x8] sm:$0xff pattern:$0x75316420] }
   0xf   :  { %v44_v6 = vsel %vm43_vm0, %v33_v4, 0.0  ;;  %v45_v7 = vsel %vm43_vm0, %v34_v5, 0.0  ;;  %61 = vst [vmem:[#allocation1] ss:$2 sm:$0xff] %v57_v2 }
  0x10   :  { %v46_v8 = vadd.f32 %v45_v7, %v44_v6  ;;  %v37_v9 = vld.sshfl [vmem:[#allocation1 + $0x10] sm:$0xff pattern:$0x75316420]  ;;  %v38_v10 = vld.sshfl [vmem:[#allocation1 + $0x18] sm:$0xff pattern:$0x75316420] }
  0x11   :  { %65 = vst [vmem:[#allocation1 + $0x10] ss:$2 sm:$0xff] %v58_v3  ;;  %v49_v11 = vsel %vm43_vm0, %v37_v9, 0.0  ;;  %v50_v12 = vsel %vm43_vm0, %v38_v10, 0.0 }
  0x12   :  { %47 = vadd.xlane.f32.xlu0 %v46_v8  ;;  %v51_v15 = vadd.f32 %v50_v12, %v49_v11 }
  0x16   :  { %v62_v13 = vld.sshfl [vmem:[#allocation1] sm:$0xff pattern:$0x75316420]  ;;  %v63_v14 = vld.sshfl [vmem:[#allocation1 + $0x8] sm:$0xff pattern:$0x75316420] }
  0x17   :  { %v72_v16 = vsel %vm43_vm0, %v62_v13, 0.0  ;;  %v73_v17 = vsel %vm43_vm0, %v63_v14, 0.0 }
  0x18   :  { %v74_v18 = vadd.f32 %v73_v17, %v72_v16  ;;  %v66_v19 = vld.sshfl [vmem:[#allocation1 + $0x10] sm:$0xff pattern:$0x75316420]  ;;  %v67_v20 = vld.sshfl [vmem:[#allocation1 + $0x18] sm:$0xff pattern:$0x75316420] }
  0x19   :  { %v77_v21 = vsel %vm43_vm0, %v66_v19, 0.0  ;;  %v78_v22 = vsel %vm43_vm0, %v67_v20, 0.0 }
  0x1a   :  { %75 = vadd.xlane.f32.xlu1 %v74_v18  ;;  %52 = vadd.xlane.f32.xlu0 %v51_v15  ;;  %v79_v23 = vadd.f32 %v78_v22, %v77_v21 }
  0x22   :  { %80 = vadd.xlane.f32.xlu1 %v79_v23 }
  0x85   :  { %v48_v24 = vpop.xlane.xlu0 %47 }
  0x86   :  { %v54_v27 = vsel %vm43_vm0, %v48_v24, 0.0 }
  0x8d   :  { %v76_v25 = vpop.xlane.xlu1 %75  ;;  %v53_v26 = vpop.xlane.xlu0 %52 }
  0x8e   :  { %v55_v28 = vsel %vm43_vm0, %v53_v26, 0.0  ;;  %v82_v32 = vsel %vm43_vm0, %v76_v25, 0.0 }
  0x8f   :  { %v56_v29 = vadd.f32 %v55_v28, %v54_v27 }
  0x91   :  { %v85_v30 = vmul.f32 0.001953125, %v56_v29 }
  0x93   :  { %122 = vst.msk [vmem:[%s279_s2] sm:$0xf] %vm121_vm1, %v85_v30  ;;  %v87_v36 = vmul.f32 %v85_v30, %v85_v30  ;;  %v101_v49 = vsub.f32 0.0, %v85_v30  ;;  %s214_s2 = smov [#allocation5]  }
  0x95   :  { %v81_v31 = vpop.xlane.xlu1 %80 }
  0x96   :  { %v83_v33 = vsel %vm43_vm0, %v81_v31, 0.0 }
  0x97   :  { %v84_v34 = vadd.f32 %v83_v33, %v82_v32 }
  0x99   :  { %v86_v35 = vmul.f32 0.001953125, %v84_v34 }
  0x9b   :  { %v88_v37 = vsub.f32 %v86_v35, %v87_v36 }
  0x9d   :  { %v89_v38 = vmax.f32 %v88_v37, 0.0 }
  0x9f   :  { %v90_v39 = vadd.f32 1e-05, %v89_v38  ;;  %123 = vst.msk [vmem:[%s280_s3] sm:$0xf] %vm121_vm1, %v89_v38  ;;  %s128_s3 = sshll.u32 %s214_s2, 4  ;;  %s129_s3 = int_to_ptr.vmem [resolvable:$true] %s128_s3 }
  0xa1   :  { %156 = vrsqrt.f32 %v90_v39  ;;  %vm97_vm3 = vweird.f32 %v90_v39 }
  0xa7   :  { %v157_v40 = vpop.eup %156 }
  0xa8   :  { %v92_v41 = vmul.f32 %v157_v40, %v90_v39  ;;  %vm98_vm2 = vweird.f32 %v157_v40 }
  0xa9   :  { %vm99_vm4 = vmor %vm97_vm3, %vm98_vm2 }
  0xaa   :  { %v93_v42 = vmul.f32 %v157_v40, %v92_v41 }
  0xac   :  { %v94_v45 = vmul.f32 0.5, %v93_v42 }
  0xae   :  { %v95_v46 = vsub.f32 1.5, %v94_v45 }
  0xb0   :  { %v96_v48 = vmul.f32 %v157_v40, %v95_v46 }
  0xb2   :  { %v100_v50 = vsel %vm99_vm4, %v157_v40, %v96_v48 }
  0xb3   :  { %v102_v51 = vmul.f32 %v101_v49, %v100_v50  ;;  %v107_v52 = vperm.slane %v100_v50, %v106_v47 }
  0xb5   :  { %v109_v53 = vmul.f32 %v107_v52, %v241_v0  ;;  %v110_v54 = vmul.f32 %v107_v52, %v243_v1  ;;  %v115_v55 = vperm.slane %v102_v51, %v106_v47 }
  0xb7   :  { %v117_v56 = vadd.f32 %v115_v55, %v109_v53  ;;  %v118_v57 = vadd.f32 %v115_v55, %v110_v54 }
  0xb9   :  { %119 = vst [vmem:[#allocation5] sm:$0xff] %v117_v56 }
  0xba   :  { %120 = vst [vmem:[#allocation5 + $0x8] sm:$0xff] %v118_v57 }
  0xbb   :  { %136 = dma.vmem_to_hbm [thread:$0]  %s129_s3, 256, %s131_s24, [#allocation4], %s211_s17, %s211_s17, %s212_s18  }
  0xbc   :  { %208 = dma.done.wait [#allocation4], 256  }
  0xbd   :  { %209 = vsyncadd [#allocation4], 4294967040 }
  0xbe   :  { %149 = vsyncpa [#allocation3], 1 }
  0xbf   :  { %150 = vsyncpa [#allocation4], 1 }

</bundles_post_ra>
